<compile_context>
chip_gen: v7x
topology: tpu7x:2x2x1
jax: 0.10.0
libtpu: 0.0.40
codegen_flags: <defaults>
</compile_context>

<pallas_src>
import functools

import jax
import jax.numpy as jnp
from jax.experimental import pallas as pl
from jax.experimental.pallas import tpu as pltpu

ALPHA = 1.0
GAMMA = 2  # specialized below as an explicit square


def _focal_loss_kernel(logits_ref, targets_ref, out_ref, *, n_total, mask_tail):
    # logits_ref : (TILE_N, C) native dtype in VMEM
    # targets_ref: (TILE_N, 1) int32 in VMEM
    # out_ref    : (8, 128) float32 block -- this tile's partial sum (broadcast)
    i = pl.program_id(0)

    x = logits_ref[...].astype(jnp.float32)             # (T, C)
    t = targets_ref[...]                                 # (T, 1)
    tile_n = x.shape[0]

    # --- cross_entropy(inputs, targets, reduction='none') pieces ---
    m = jnp.max(x, axis=-1, keepdims=True)               # (T, 1)
    e = jnp.exp(x - m)                                    # (T, C)  (EUP)
    sumexp = jnp.sum(e, axis=-1, keepdims=True)           # (T, 1)

    col = jax.lax.broadcasted_iota(jnp.int32, x.shape, 1)            # (T, C)
    onehot = col == t                                                  # (T, C)
    tgt_logit = jnp.sum(jnp.where(onehot, x, 0.0), axis=-1, keepdims=True)  # x[target]

    ce = jnp.log(sumexp) + m - tgt_logit                  # per-row BCE_loss
    pt = jnp.exp(-ce)                                      # one per-row EUP exp
    w = 1.0 - pt
    f_loss = ALPHA * (w * w) * ce                          # gamma == 2 -> square

    # Steady-state path: no tail masking.
    out_ref[...] = jnp.full((8, 128), jnp.sum(f_loss), jnp.float32)

    if mask_tail:
        # Only the last tile has padded garbage rows; mask them there only.
        @pl.when(i == pl.num_programs(0) - 1)
        def _mask_tail():
            row = jax.lax.broadcasted_iota(jnp.int32, f_loss.shape, 0) + i * tile_n
            masked = jnp.where(row < n_total, f_loss, 0.0)
            out_ref[...] = jnp.full((8, 128), jnp.sum(masked), jnp.float32)


def _choose_tile_n(n, c, itemsize):
    # Size by ELEMENTS so the in-kernel f32 intermediates (x, e, onehot, ...)
    # stay ~4 MiB each: ~1M elements per tile.  With double-buffered inputs
    # plus a handful of live intermediates the footprint stays well inside the
    # scoped VMEM budget on every generation (v7x: 64 MiB physical).
    budget_elems = 1 * 1024 * 1024
    del itemsize  # intermediates (f32) dominate, not the native-dtype input
    t = budget_elems // max(1, c)
    t = max(8, (int(t) // 8) * 8)          # sublane-aligned block rows
    n_pad8 = ((n + 7) // 8) * 8
    return max(8, min(t, n_pad8))


def focal_loss(logits, targets, *, tile_n=None):
    """logits: (N, C) float (any dtype); targets: (N,) int class ids -> scalar f32."""
    n, c = logits.shape
    targets_col = targets.astype(jnp.int32).reshape(n, 1)
    itemsize = jnp.dtype(logits.dtype).itemsize
    if tile_n is None:
        tile_n = _choose_tile_n(n, c, itemsize)
    assert tile_n % 8 == 0, "tile_n must be a multiple of 8 (sublane tiling)"
    num_tiles = pl.cdiv(n, tile_n)
    mask_tail = (n % tile_n) != 0           # static: skip tail mask when divisible

    kernel = functools.partial(_focal_loss_kernel, n_total=n, mask_tail=mask_tail)

    cost = pl.CostEstimate(
        flops=8 * n * c,
        transcendentals=n * c + 2 * n,
        bytes_accessed=n * c * itemsize + n * 4 + num_tiles * 8 * 128 * 4,
    )

    # TODO(synk): sweep pipeline_mode=pl.Buffered(3) on the logits BlockSpec
    # on v7x; keep the default depth of 2 unless measured to help.
    partials = pl.pallas_call(
        kernel,
        out_shape=jax.ShapeDtypeStruct((num_tiles * 8, 128), jnp.float32),
        grid_spec=pltpu.PrefetchScalarGridSpec(
            num_scalar_prefetch=0,
            grid=(num_tiles,),
            in_specs=[
                pl.BlockSpec((tile_n, c), lambda i: (i, 0)),   # full-C (lane) block
                pl.BlockSpec((tile_n, 1), lambda i: (i, 0)),
            ],
            out_specs=pl.BlockSpec((8, 128), lambda i: (i, 0)),  # per-tile partial
        ),
        compiler_params=pltpu.CompilerParams(
            # No loop-carried state: each grid step writes its own output
            # block, so both v7x TensorCores can split the batch axis.
            dimension_semantics=("parallel",),
            # v5e's default scoped VMEM is only 16 MiB; raise it (still far
            # below v7x's 64 MiB physical per-TC VMEM).
            vmem_limit_bytes=48 * 1024 * 1024,
        ),
        cost_estimate=cost,
    )(logits, targets_col)                   # NOTE: no wrapper-side f32 upcast

    # Every (8,128) output block is filled with its tile's partial sum;
    # take one representative element per tile and finish the mean here.
    per_tile = partials[::8, 0]               # (num_tiles,)
    return jnp.sum(per_tile) / jnp.float32(n)


def _focal_loss_ref(logits, targets):
    # Pure-JAX reference (matches PyTorch FocalLoss defaults).
    x = logits.astype(jnp.float32)
    lse = jax.scipy.special.logsumexp(x, axis=-1)
    tgt = jnp.take_along_axis(x, targets[:, None], axis=-1)[:, 0]
    ce = lse - tgt
    pt = jnp.exp(-ce)
    return jnp.mean(ALPHA * (1.0 - pt) ** 2 * ce)


if __name__ == "__main__":
    key = jax.random.PRNGKey(0)
    k1, k2 = jax.random.split(key)
    N, C = 24, 32
    logits = jax.random.normal(k1, (N, C), dtype=jnp.float32)
    targets = jax.random.randint(k2, (N,), 0, C, dtype=jnp.int32)

    ref = _focal_loss_ref(logits, targets)

    # Forced multi-tile path (grid=2, masked tail rows in the last tile).
    loss_tiled = focal_loss(logits, targets, tile_n=16)
    jax.block_until_ready(loss_tiled)
    assert jnp.allclose(loss_tiled, ref, rtol=1e-4, atol=1e-6), (loss_tiled, ref)

    # Default (auto) tile size (single tile here).
    loss_auto = focal_loss(logits, targets)
    jax.block_until_ready(loss_auto)
    assert jnp.allclose(loss_auto, ref, rtol=1e-4, atol=1e-6), (loss_auto, ref)

    # Native-bf16 path: no wrapper upcast, cast happens in-kernel.
    loss_bf16 = focal_loss(logits.astype(jnp.bfloat16), targets)
    jax.block_until_ready(loss_bf16)
    assert jnp.allclose(loss_bf16, ref, rtol=5e-2, atol=1e-3), (loss_bf16, ref)

    print("KERNEL_OK")
</pallas_src>

<mosaic_0001>
module attributes {stable_mosaic.version = 11 : i64} {
  func.func @_focal_loss_kernel(%arg0: i32, %arg1: memref<16x32xf32, #tpu.memory_space<vmem>>, %arg2: memref<16x1xi32, #tpu.memory_space<vmem>>, %arg3: memref<8x128xf32, #tpu.memory_space<vmem>>) attributes {dimension_semantics = [#tpu.dimension_semantics<parallel>], iteration_bounds = array<i64: 2>, scalar_prefetch = 0 : i64, scratch_operands = 0 : i64, tpu.core_type = #tpu.core_type<tc>, window_params = [{transform_indices = @transform_0, window_bounds = array<i64: 16, 32>}, {transform_indices = @transform_1, window_bounds = array<i64: 16, 1>}, {transform_indices = @transform_2, window_bounds = array<i64: 8, 128>}]} {
    %c0 = arith.constant 0 : index
    %c0_0 = arith.constant 0 : index
    %0 = vector.load %arg1[%c0, %c0_0] : memref<16x32xf32, #tpu.memory_space<vmem>>, vector<16x32xf32>
    %c0_1 = arith.constant 0 : index
    %c0_2 = arith.constant 0 : index
    %1 = vector.load %arg2[%c0_1, %c0_2] : memref<16x1xi32, #tpu.memory_space<vmem>>, vector<16x1xi32>
    %cst = arith.constant dense<0xFF800000> : vector<16xf32>
    %2 = vector.multi_reduction <maximumf>, %0, %cst [1] : vector<16x32xf32> to vector<16xf32>
    %3 = vector.shape_cast %2 : vector<16xf32> to vector<16x1xf32>
    %4 = vector.broadcast %3 : vector<16x1xf32> to vector<16x32xf32>
    %5 = arith.subf %0, %4 : vector<16x32xf32>
    %6 = math.exp %5 : vector<16x32xf32>
    %cst_3 = arith.constant dense<0.000000e+00> : vector<16xf32>
    %7 = vector.multi_reduction <add>, %6, %cst_3 [1] : vector<16x32xf32> to vector<16xf32>
    %8 = vector.shape_cast %7 : vector<16xf32> to vector<16x1xf32>
    %9 = tpu.iota {dimensions = array<i32: 1>} : vector<16x32xi32>
    %10 = vector.broadcast %1 : vector<16x1xi32> to vector<16x32xi32>
    %11 = arith.cmpi eq, %9, %10 : vector<16x32xi32>
    %cst_4 = arith.constant 0.000000e+00 : f32
    %12 = vector.broadcast %cst_4 : f32 to vector<16x32xf32>
    %13 = arith.select %11, %0, %12 : vector<16x32xi1>, vector<16x32xf32>
    %cst_5 = arith.constant dense<0.000000e+00> : vector<16xf32>
    %14 = vector.multi_reduction <add>, %13, %cst_5 [1] : vector<16x32xf32> to vector<16xf32>
    %15 = vector.shape_cast %14 : vector<16xf32> to vector<16x1xf32>
    %16 = math.log %8 : vector<16x1xf32>
    %17 = arith.addf %16, %3 : vector<16x1xf32>
    %18 = arith.subf %17, %15 : vector<16x1xf32>
    %cst_6 = arith.constant 0.000000e+00 : f32
    %19 = vector.broadcast %cst_6 : f32 to vector<16x1xf32>
    %20 = arith.subf %19, %18 : vector<16x1xf32>
    %21 = math.exp %20 : vector<16x1xf32>
    %cst_7 = arith.constant 1.000000e+00 : f32
    %22 = vector.broadcast %cst_7 : f32 to vector<16x1xf32>
    %23 = arith.subf %22, %21 : vector<16x1xf32>
    %24 = arith.mulf %23, %23 : vector<16x1xf32>
    %cst_8 = arith.constant 1.000000e+00 : f32
    %25 = vector.broadcast %cst_8 : f32 to vector<16x1xf32>
    %26 = arith.mulf %25, %24 : vector<16x1xf32>
    %27 = arith.mulf %26, %18 : vector<16x1xf32>
    %28 = vector.shape_cast %27 : vector<16x1xf32> to vector<1x16x1xf32>
    %cst_9 = arith.constant dense<0.000000e+00> : vector<1xf32>
    %29 = vector.multi_reduction <add>, %28, %cst_9 [1, 2] : vector<1x16x1xf32> to vector<1xf32>
    %30 = vector.shape_cast %29 : vector<1xf32> to vector<1x1x1xf32>
    %31 = vector.extract %30[0, 0, 0] : f32 from vector<1x1x1xf32>
    %32 = vector.broadcast %31 : f32 to vector<8x128xf32>
    %c0_10 = arith.constant 0 : index
    %c0_11 = arith.constant 0 : index
    %33 = vector.load %arg3[%c0_10, %c0_11] : memref<8x128xf32, #tpu.memory_space<vmem>>, vector<8x128xf32>
    tpu.vector_store %arg3[%c0_10, %c0_11], %32 {strides = array<i32>} : memref<8x128xf32, #tpu.memory_space<vmem>>, vector<8x128xf32>,
    %c1_i32 = arith.constant 1 : i32
    %34 = arith.cmpi eq, %arg0, %c1_i32 : i32
    %35 = arith.extui %34 : i1 to i32
    %c0_i32 = arith.constant 0 : i32
    %36 = arith.cmpi ne, %35, %c0_i32 : i32
    scf.if %36 {
      %37 = tpu.iota {dimensions = array<i32: 0>} : vector<16x1xi32>
      %c16_i32 = arith.constant 16 : i32
      %38 = arith.muli %arg0, %c16_i32 : i32
      %39 = vector.broadcast %38 : i32 to vector<16x1xi32>
      %40 = arith.addi %37, %39 : vector<16x1xi32>
      %c24_i32 = arith.constant 24 : i32
      %41 = vector.broadcast %c24_i32 : i32 to vector<16x1xi32>
      %42 = arith.cmpi slt, %40, %41 : vector<16x1xi32>
      %cst_12 = arith.constant 0.000000e+00 : f32
      %43 = vector.broadcast %cst_12 : f32 to vector<16x1xf32>
      %44 = arith.select %42, %27, %43 : vector<16x1xi1>, vector<16x1xf32>
      %45 = vector.shape_cast %44 : vector<16x1xf32> to vector<1x16x1xf32>
      %cst_13 = arith.constant dense<0.000000e+00> : vector<1xf32>
      %46 = vector.multi_reduction <add>, %45, %cst_13 [1, 2] : vector<1x16x1xf32> to vector<1xf32>
      %47 = vector.shape_cast %46 : vector<1xf32> to vector<1x1x1xf32>
      %48 = vector.extract %47[0, 0, 0] : f32 from vector<1x1x1xf32>
      %49 = vector.broadcast %48 : f32 to vector<8x128xf32>
      %c0_14 = arith.constant 0 : index
      %c0_15 = arith.constant 0 : index
      %50 = vector.load %arg3[%c0_14, %c0_15] : memref<8x128xf32, #tpu.memory_space<vmem>>, vector<8x128xf32>
      tpu.vector_store %arg3[%c0_14, %c0_15], %49 {strides = array<i32>} : memref<8x128xf32, #tpu.memory_space<vmem>>, vector<8x128xf32>,
    } else {
    }
    return
  }
  func.func @transform_0(%arg0: i32) -> (i32, i32) {
    %c0_i32 = arith.constant 0 : i32
    %c0_i32_0 = arith.constant 0 : i32
    return %arg0, %c0_i32 : i32, i32
  }
  func.func @transform_1(%arg0: i32) -> (i32, i32) {
    %c0_i32 = arith.constant 0 : i32
    %c0_i32_0 = arith.constant 0 : i32
    return %arg0, %c0_i32 : i32, i32
  }
  func.func @transform_2(%arg0: i32) -> (i32, i32) {
    %c0_i32 = arith.constant 0 : i32
    %c0_i32_0 = arith.constant 0 : i32
    return %arg0, %c0_i32 : i32, i32
  }
}

</mosaic_0001>

<bundles_post_ra>
// kernel: tpu_custom_call.1
= control target key start
LH: loop header
LB: loop body
LE: loop exit
PB: predicated region body
PF: predicated region fallthrough
CT: control target
= control target key end

     0   :  { %7 = vsyncpa [#allocation3], 0  ;;  %s669_s0 = inlined_call_operand.vmem [shape: f32[24,32], index: 0, kind: input, shape index: {}]   ;;  %s670_s1 = inlined_call_operand.vmem [shape: s32[24,1], index: 1, kind: input, shape index: {}]   ;;  %s671_s2 = inlined_call_operand.hbm [shape: f32[16,128], index: 2, kind: output, shape index: {}]  }
   0x1   :  { %9 = vsyncpa [#allocation3 + $0x1], 0  ;;  %s550_s9 = smov 0   ;;  %s552_s10 = smov 0  }
   0x2   :  { %s554_s11 = smov 0   ;;  %s556_s12 = smov 0  }
   0x3 LB: > { %s571_s13 = sadd.s32 4294967295, %s531_s12   ;;  %s396_s14 = sadd.s32 4294967294, %s531_s12   ;;  %s531_s12 = sphi %s556_s12, %s677_s12   ;;  %s527_s11 = sphi %s554_s11, %s676_s11   ;;  %s523_s10 = sphi %s552_s10, %s675_s10   ;;  %s519_s9 = sphi %s550_s9, %s674_s9  }
   0x4   : > { %s575_s15 = sadd.s32 1, %s531_s12   ;;  %s74_s16 = sadd.s32 1, %s527_s11 }
   0x5   : > { %s71_s17 = ssub.s32 %s531_s12, %s575_s15  ;;  %p84_p0 = scmp.ne.s32.totalorder %s527_s11, %s523_s10 }
   0x6   : > { %p72_p1 = scmp.eq.s32.totalorder %s71_s17, 0  ;;  %p85_p2 = scmp.eq.s32.totalorder %s571_s13, 1 }
   0x7   : > { %p90_p3 = scmp.ne.s32.totalorder %s523_s10, %s519_s9  ;;  %p91_p4 = scmp.eq.s32.totalorder %s396_s14, 1 }
   0x8   : > { %s586_s18 = scalar_select %p72_p1, %s527_s11, %s74_s16  }
   0x9   : > { %p588_p5 = por %p85_p2, %p84_p0  ;;  %p592_p6 = por %p91_p4, %p90_p3 }
   0xa   : > { %p399_p7 = scmp.ge.s32.totalorder %s531_s12, 1  ;;  %p143_p8 = scmp.lt.s32.totalorder %s531_s12, 3 }
   0xc   : > { %p144_p9 = pnand %p399_p7, %p143_p8 }
   0xd   : > { %s401_s21 = sshll.u32 (!%p144_p9), %s571_s13, 1  ;;  %v533_v0 = vmov (!%p144_p9), 0   ;;  %vm210_vm0 = vcmask (!%p144_p9), 261120   ;;  %v229_v11 = vlaneseq (!%p144_p9)  ;;  %vm267_vm3 = vcmask (!%p144_p9), 7168   ;;  %s175_s29 = sand.u32 (!%p144_p9), 1, %s523_s10  }
   0xe   : > { %147 = sbr.rel (%p144_p9) target bundleno = 605 (0x25d), region = 28  ;;  %p183_p10 = scmp.lt.s32.totalorder (!%p144_p9), %s401_s21, 2  ;;  %455 = vset.pattern.permute.xlu1 (!%p144_p9), %v533_v0  ;;  %456 = vset.pattern.permute.xlu0 (!%p144_p9), %v533_v0 }
   0xf   : > { %v230_v15 = vand.u32 (!%p144_p9), 127, %v229_v11  ;;  %s400_s30 = sshll.u32 (!%p144_p9), %s175_s29, 3  ;;  %p405_p11 = scmp.ne.s32.totalorder (!%p144_p9), %s571_s13, 1 }
  0x10   : > { %s617_s4 = scalar_lea.vmem (!%p144_p9), [#allocation2], %s400_s30 }
  0x15   : > { %s679_s21 = smov (!%p183_p10, %s401_s21), 2  ;;  %v287_v60 = vshrl.u32 (!%p405_p11), %v229_v11, 7  ;;  %s406_s5 = sshll.u32 (!%p405_p11), %s571_s13, 4 }
  0x16   : > { %s402_s22 = sshll.u32 %s679_s21, 3  ;;  %v290_v61 = vstv (!%p405_p11), %s406_s5 }
  0x17   : > { %s186_s25 = scalar_lea.vmem %s669_s0, %s402_s22  ;;  %s200_s28 = scalar_lea.vmem %s670_s1, %s402_s22  ;;  %v288_v62 = vadd.s32 (!%p405_p11), 8, %v287_v60  ;;  %v291_v63 = vadd.s32 (!%p405_p11), %v290_v61, %v287_v60 }
  0x18   : > { %v206_v1 = vld [vmem:[%s186_s25] sm:$0xff]  ;;  %v207_v2 = vld [vmem:[%s186_s25 + $0x8] sm:$0xff] }
  0x19   : > { %v208_v3 = vld [vmem:[%s200_s28] sm:$0xff]  ;;  %v211_v4 = vsel %vm210_vm0, %v206_v1, -inf  ;;  %v209_v5 = vld [vmem:[%s200_s28 + $0x8] sm:$0xff]  ;;  %v214_v6 = vsel %vm210_vm0, %v207_v2, -inf  ;;  %v292_v0 = vadd.s32 (!%p405_p11), %v290_v61, %v288_v62  ;;  %vm293_vm4 = vcmp.lt.s32.totalorder (!%p405_p11), %v291_v63, 24 }
  0x1a   : > { %232 = vperm.xlu1 %455, %v208_v3   ;;  %212 = vmax.xlane.f32.xlu0 %v211_v4 }
  0x1b   : > { %vm294_vm5 = vcmp.lt.s32.totalorder (!%p405_p11), %v292_v0, 24 }
  0x1e   : > { %235 = vperm.xlu1 %455, %v209_v5   ;;  %215 = vmax.xlane.f32.xlu0 %v214_v6 }
  0x99   : > { %v233_v14 = vpop.permute.xlu1 %232 }
  0x9a   : > { %vm237_vm1 = vcmp.eq.s32.totalorder %v230_v15, %v233_v14 }
  0x9b   : > { %v239_v18 = vsel %vm237_vm1, %v206_v1, 0.0 }
  0x9c   : > { %v241_v20 = vsel %vm210_vm0, %v239_v18, 0.0 }
  0x9d   : > { %v236_v16 = vpop.permute.xlu1 %235 }
  0x9e   : > { %vm238_vm2 = vcmp.eq.s32.totalorder %v230_v15, %v236_v16 }
  0x9f   : > { %v240_v22 = vsel %vm238_vm2, %v207_v2, 0.0 }
  0xa0   : > { %v244_v24 = vsel %vm210_vm0, %v240_v22, 0.0 }
  0xa7   : > { %v213_v7 = vpop.xlane.xlu0 %212 }
  0xa8   : > { %v217_v8 = vsub.f32 %v206_v1, %v213_v7 }
  0xaa   : > { %v219_v9 = vmul.f32 1.442695, %v217_v8 }
  0xab   : > { %v216_v10 = vpop.xlane.xlu0 %215 }
  0xac   : > { %457 = vpow2.f32 %v219_v9  ;;  %v218_v12 = vsub.f32 %v207_v2, %v216_v10 }
  0xae   : > { %v221_v13 = vmul.f32 1.442695, %v218_v12 }
  0xb0   : > { %459 = vpow2.f32 %v221_v13 }
  0xb6   : > { %v458_v17 = vpop.eup %457 }
  0xb7   : > { %v223_v19 = vsel %vm210_vm0, %v458_v17, 0.0 }
  0xb8   : > { %224 = vadd.xlane.f32.xlu0 %v223_v19 }
  0xba   : > { %v460_v21 = vpop.eup %459 }
  0xbb   : > { %v226_v23 = vsel %vm210_vm0, %v460_v21, 0.0 }
  0xbc   : > { %227 = vadd.xlane.f32.xlu1 %v226_v23  ;;  %242 = vadd.xlane.f32.xlu0 %v241_v20 }
  0xc0   : > { %245 = vadd.xlane.f32.xlu0 %v244_v24 }
 0x145   : > { %v225_v25 = vpop.xlane.xlu0 %224 }
 0x146   : > { %461 = vlog2.f32 %v225_v25 }
 0x149   : > { %v228_v26 = vpop.xlane.xlu1 %227  ;;  %v243_v29 = vpop.xlane.xlu0 %242 }
 0x14a   : > { %463 = vlog2.f32 %v228_v26 }
 0x14d   : > { %v246_v36 = vpop.xlane.xlu0 %245 }
 0x150   : > { %v462_v27 = vpop.eup %461 }
 0x151   : > { %v248_v28 = vmul.f32 0.6931472, %v462_v27 }
 0x153   : > { %v251_v30 = vadd.f32 %v248_v28, %v213_v7 }
 0x154   : > { %v464_v31 = vpop.eup %463 }
 0x155   : > { %v250_v32 = vmul.f32 0.6931472, %v464_v31  ;;  %v253_v33 = vsub.f32 %v251_v30, %v243_v29 }
 0x157   : > { %v255_v34 = vsub.f32 0.0, %v253_v33  ;;  %v252_v35 = vadd.f32 %v250_v32, %v216_v10 }
 0x159   : > { %v257_v37 = vmul.f32 1.442695, %v255_v34  ;;  %v254_v38 = vsub.f32 %v252_v35, %v246_v36 }
 0x15b   : > { %465 = vpow2.f32 %v257_v37  ;;  %v256_v39 = vsub.f32 0.0, %v254_v38 }
 0x15d   : > { %v259_v40 = vmul.f32 1.442695, %v256_v39 }
 0x15f   : > { %467 = vpow2.f32 %v259_v40 }
 0x165   : > { %v466_v41 = vpop.eup %465 }
 0x166   : > { %v261_v42 = vsub.f32 1.0, %v466_v41 }
 0x168   : > { %v263_v43 = vmul.f32 %v261_v42, %v261_v42 }
 0x169   : > { %v468_v44 = vpop.eup %467 }
 0x16a   : > { %v262_v45 = vsub.f32 1.0, %v468_v44  ;;  %v265_v46 = vmul.f32 %v263_v43, %v253_v33 }
 0x16c   : > { %v264_v47 = vmul.f32 %v262_v45, %v262_v45  ;;  %v268_v49 = vsel %vm267_vm3, %v265_v46, 0.0  ;;  %v295_v1 = vsel (!%p405_p11), %vm293_vm4, %v265_v46, 0.0 }
 0x16d   : > { %v297_v2 = vsel (!%p405_p11), %vm267_vm3, %v295_v1, 0.0 }
 0x16e   : > { %v266_v48 = vmul.f32 %v264_v47, %v254_v38 }
 0x170   : > { %v269_v50 = vsel %vm267_vm3, %v266_v48, 0.0  ;;  %v296_v3 = vsel (!%p405_p11), %vm294_vm5, %v266_v48, 0.0 }
 0x171   : > { %v270_v51 = vadd.f32 %v269_v50, %v268_v49  ;;  %v298_v4 = vsel (!%p405_p11), %vm267_vm3, %v296_v3, 0.0 }
 0x172   : > { %v299_v5 = vadd.f32 (!%p405_p11), %v298_v4, %v297_v2 }
 0x173   : > { %271 = vadd.xlane.f32.xlu0 %v270_v51 }
 0x177   : > { %300 = vadd.xlane.f32.xlu0 (!%p405_p11), %v299_v5 }
 0x200   : > { %v272_v52 = vpop.xlane.xlu0 %271 }
 0x201   : > { %v273_v53 = vrot.slane %v272_v52, 4 }
 0x203   : > { %v274_v54 = vadd.f32 %v273_v53, %v272_v52 }
 0x204   : > { %v301_v6 = vpop.xlane.xlu0 (!%p405_p11), %300 }
 0x205   : > { %v275_v55 = vrot.slane %v274_v54, 2  ;;  %v302_v7 = vrot.slane (!%p405_p11), %v301_v6, 4 }
 0x207   : > { %v276_v56 = vadd.f32 %v275_v55, %v274_v54  ;;  %v303_v8 = vadd.f32 (!%p405_p11), %v302_v7, %v301_v6 }
 0x209   : > { %v277_v57 = vrot.slane %v276_v56, 1  ;;  %v304_v9 = vrot.slane (!%p405_p11), %v303_v8, 2 }
 0x20b   : > { %v278_v58 = vadd.f32 %v277_v57, %v276_v56  ;;  %v305_v10 = vadd.f32 (!%p405_p11), %v304_v9, %v303_v8 }
 0x20d   : > { %411 = vpush %v278_v58  ;;  %v306_v11 = vrot.slane (!%p405_p11), %v305_v10, 1 }
 0x20f   : > { %v307_v12 = vadd.f32 (!%p405_p11), %v306_v11, %v305_v10 }
 0x211   : > { %413 = vpush (!%p405_p11), %v307_v12 }
 0x23a   : > { %285 = sbr.rel (%p405_p11) target bundleno = 581 (0x245), region = 32 }
 0x23e   : > { %s412_s3 = spop %411 }
 0x23f   : > { %v280_v59 = vstv %s412_s3 }
 0x240   : > { %281 = vst [vmem:[%s617_s4] sm:$0xff] %v280_v59 }
 0x242   : > { %s414_s6 = spop %413 }
 0x243   : > { %v309_v13 = vstv %s414_s6 }
 0x244   : > { %310 = vst [vmem:[%s617_s4] sm:$0xff] %v309_v13 }
 0x245 PF: > { %s408_s7 = sshll.u32 %s571_s13, 7  ;;  %s325_s17 = sshll.u32 %s617_s4, 4  ;;  %s326_s17 = int_to_ptr.vmem [resolvable:$true] %s325_s17 }
 0x246   : > { %s630_s16 = scalar_lea.hbm %s671_s2, %s408_s7  ;;  %s312_s21 = scalar_lea.sflag [#allocation3], %s175_s29 }
 0x247   : > { %s469_s22 = scalar_lea.vmem %s326_s17, 128  ;;  %s534_s23 = smov [#allocation2]  }
 0x248   : > { %p470_p12 = scmp.ne.s32.totalorder %s326_s17, %s469_s22  ;;  %s473_s24 = sshll.u32 %s534_s23, 4  ;;  %s474_s24 = int_to_ptr.vmem [resolvable:$false] %s473_s24 }
 0x249   : > { %s475_s25 = scalar_lea.vmem %s474_s24, 256  ;;  %p476_p1 = scmp.lt.s32.totalorder %s326_s17, %s474_s24 }
 0x24a   : > { %p471_p13 = pnand %p470_p12, %p588_p5  ;;  %p477_p2 = scmp.lt.s32.totalorder %s475_s25, %s469_s22 }
 0x24c   : > { %p472_p0 = pneg %p471_p13  ;;  %p478_p3 = por %p477_p2, %p476_p1 }
 0x24e   : > { %p479_p4 = pnand %p478_p3, %p472_p0 }
 0x250   : > { %482 = shalt.err (!%p479_p4)
}
 0x251   : > { %s483_s13 = scalar_lea.hbm %s630_s16, 128  ;;  %s487_s28 = scalar_lea.hbm %s671_s2, 256 }
 0x252   : > { %p484_p7 = scmp.ne.s32.totalorder %s630_s16, %s483_s13  ;;  %p488_p10 = scmp.lt.u32.totalorder %s630_s16, %s671_s2 }
 0x253   : > { %p489_p11 = scmp.lt.u32.totalorder %s487_s28, %s483_s13  ;;  %p491_p13 = scmp.lt.u32.totalorder %s483_s13, %s630_s16 }
 0x254   : > { %p485_p8 = pnand %p484_p7, %p588_p5 }
 0x255   : > { %p490_p12 = por %p489_p11, %p488_p10 }
 0x256   : > { %p486_p9 = pneg %p485_p8 }
 0x257   : > { %p492_p0 = por %p491_p13, %p490_p12 }
 0x259   : > { %p493_p1 = pnand %p492_p0, %p486_p9 }
 0x25b   : > { %496 = shalt.err (!%p493_p1)
}
 0x25c   : > { %415 = dma.vmem_to_hbm [thread:$0]  (%p588_p5), %s326_s17, 128, %s630_s16, %s312_s21  }
 0x25d PF: > { %p421_p2 = scmp.ge.s32.totalorder %s531_s12, 2  ;;  %s337_s3 = sand.u32 1, %s519_s9  }
 0x25e   : > { %s338_s4 = scalar_lea.sflag [#allocation3], %s337_s3 }
 0x25f   : > { %p418_p3 = pnand %p421_p2, %p592_p6 }
 0x261   : > { %514 = dma.done.wait (!%p418_p3), %s338_s4, 128  }
 0x262   : > { %516 = vsyncadd (!%p418_p3), %s338_s4, 4294967168  ;;  %p12_p4 = scmp.ge.s32.totalorder %s575_s15, 4   ;;  %s674_s9 = smov %s523_s10 }
 0x263   : > { %s675_s10 = smov %s527_s11  ;;  %s676_s11 = smov %s586_s18 }
 0x264   : > { %s677_s12 = smov %s575_s15  ;;  %14 = sbr.rel (!%p12_p4) target bundleno = 3 (0x3), region = 70 }
 0x26b   :  { %343 = vsyncpa [#allocation3], 1 }
 0x26c   :  { %345 = vsyncpa [#allocation3 + $0x1], 1 }

</bundles_post_ra>
